<compile_context>
chip_gen: v7x
topology: tpu7x:2x2x1
jax: 0.10.0
libtpu: 0.0.40
codegen_flags: <defaults>
</compile_context>

<pallas_src>
import functools

import jax
import jax.numpy as jnp
from jax import lax
from jax.experimental import pallas as pl
from jax.experimental.pallas import tpu as pltpu

_GUARD = 128  # lane-aligned zero guard band that realizes the spatial zero padding


def _round_up(x, m):
    return (x + m - 1) // m * m


def _conv_lrelu_kernel(x_ref, w_ref, b_ref, col_ref, o_ref, *,
                       W, KH, KW, pad, negative_slope, mxu_dtype):
    """One grid step == one batch element (NCHW-compatible flat-spatial layout).

    x_ref  : (1, Cin_pad, H*W)      channels in sublanes, flat spatial in lanes
    w_ref  : (Cout, KH*KW*Cin_pad)  weights, rows ordered (kh, kw, ci)
    b_ref  : (Cout, 1)              bias
    col_ref: (1, H*W)               int32 w-coordinate of each flat position
    o_ref  : (1, Cout, H*W)         output (lane-dense: last dim is H*W)
    """
    cin_p = x_ref.shape[1]
    hw = x_ref.shape[2]

    x = x_ref[0]            # (Cin_pad, HW)
    col = col_ref[...]      # (1, HW)

    # Lane-aligned zero guard bands on the flat spatial axis: positions that fall
    # off the top/bottom image rows read zeros, so no HBM-side jnp.pad is needed
    # and each 3x3 tap becomes a plain static slice of xz.
    guard = jnp.zeros((cin_p, _GUARD), x.dtype)
    xz = jnp.concatenate([guard, x, guard], axis=-1)   # (Cin_pad, GUARD+HW+GUARD)

    taps = []
    for kh in range(KH):
        dh = kh - pad
        for kw in range(KW):
            dw = kw - pad
            off = dh * W + dw
            # t[:, p] = x[:, p + off], zero-filled outside [0, HW).
            t = xz[:, _GUARD + off:_GUARD + off + hw]
            # The flat shift wraps across image rows at the W boundary; mask it.
            if dw > 0:
                t = jnp.where(col < W - dw, t, 0.0)
            elif dw < 0:
                t = jnp.where(col >= -dw, t, 0.0)
            taps.append(t)

    # Single im2col matrix (tile-aligned pieces: Cin_pad is a multiple of 8)
    # -> one fused MXU contraction with K = KH*KW*Cin_pad.
    im2col = jnp.concatenate(taps, axis=0)             # (KH*KW*Cin_pad, HW)
    acc = jnp.dot(w_ref[...].astype(mxu_dtype),
                  im2col.astype(mxu_dtype),
                  preferred_element_type=jnp.float32)  # (Cout, HW) f32 accumulator
    acc = acc + b_ref[...]                             # bias broadcast (Cout, 1)
    out = jnp.where(acc >= 0, acc, negative_slope * acc)   # LeakyReLU(0.2)
    o_ref[...] = out[None, :, :].astype(o_ref.dtype)


def conv_leaky_relu2d(x_nchw, weight, bias, *, padding=1, negative_slope=0.2,
                      mxu_dtype=jnp.bfloat16):
    """F.leaky_relu(nn.Conv2d(Cin, Cout, 3, padding=1)(x), 0.2) for NCHW inputs."""
    # TODO(synk): only the module defaults (stride=1, dilation=1, groups=1, 'same'
    # padding) are implemented; other Conv2d configs need a different index map.
    # TODO(synk): for large H*W add a spatial row-tile grid axis (halo handled by
    # the guard bands) so blocks fit v7x's 64 MiB VMEM and both TensorCores get
    # work when N is small.
    N, Cin, H, W = x_nchw.shape
    Cout, Cin_w, KH, KW = weight.shape
    assert Cin == Cin_w
    assert 2 * padding == KH - 1 == KW - 1, "kernel assumes 'same' conv (pad=(k-1)/2)"

    HW = H * W
    # NCHW -> (N, C, H*W) is a free, contiguous reshape: no transpose/pad HBM passes.
    x_flat = x_nchw.reshape(N, Cin, HW)

    # Pad channels to a multiple of 8 (sublane tile) so the in-kernel im2col
    # concatenation is tile-aligned.  No-op when Cin is already a multiple of 8.
    Cin_pad = _round_up(Cin, 8)
    if Cin_pad != Cin:
        x_flat = jnp.pad(x_flat, ((0, 0), (0, Cin_pad - Cin), (0, 0)))
        weight = jnp.pad(weight, ((0, 0), (0, Cin_pad - Cin), (0, 0), (0, 0)))

    # (Cout, KH*KW*Cin_pad): rows ordered (kh, kw, ci) to match the kernel's im2col.
    w_mat = jnp.transpose(weight, (0, 2, 3, 1)).reshape(Cout, KH * KW * Cin_pad)
    b_col = bias.reshape(Cout, 1)
    col_ids = jax.lax.broadcasted_iota(jnp.int32, (1, HW), 1) % W  # tiny, computed once

    kernel = functools.partial(
        _conv_lrelu_kernel, W=W, KH=KH, KW=KW, pad=padding,
        negative_slope=negative_slope, mxu_dtype=mxu_dtype)

    flops = 2 * N * HW * Cout * KH * KW * Cin
    bytes_accessed = (
        x_flat.size * x_flat.dtype.itemsize
        + w_mat.size * w_mat.dtype.itemsize
        + b_col.size * b_col.dtype.itemsize
        + col_ids.size * 4
        + N * Cout * HW * x_nchw.dtype.itemsize)

    out_flat = pl.pallas_call(
        kernel,
        out_shape=jax.ShapeDtypeStruct((N, Cout, HW), x_nchw.dtype),
        grid=(N,),
        in_specs=[
            pl.BlockSpec((1, Cin_pad, HW), lambda n: (n, 0, 0)),
            pl.BlockSpec((Cout, KH * KW * Cin_pad), lambda n: (0, 0)),
            pl.BlockSpec((Cout, 1), lambda n: (0, 0)),
            pl.BlockSpec((1, HW), lambda n: (0, 0)),
        ],
        out_specs=pl.BlockSpec((1, Cout, HW), lambda n: (n, 0, 0)),
        compiler_params=pltpu.CompilerParams(dimension_semantics=("parallel",)),
        cost_estimate=pl.CostEstimate(
            flops=flops, transcendentals=0, bytes_accessed=bytes_accessed),
    )(x_flat, w_mat, b_col, col_ids)

    # (N, Cout, H*W) -> NCHW is again a free reshape (no transpose).
    return out_flat.reshape(N, Cout, H, W)


if __name__ == "__main__":
    N, Cin, H, W = 2, 4, 16, 16
    Cout, KH, KW = 8, 3, 3
    negative_slope = 0.2

    key = jax.random.PRNGKey(0)
    kx, kw_, kb = jax.random.split(key, 3)

    x = jax.random.normal(kx, (N, Cin, H, W), dtype=jnp.float32)
    # Deterministic in-script parameter init (PyTorch-style fan-in scaling).
    fan_in = Cin * KH * KW
    bound = 1.0 / (fan_in ** 0.5)
    weight = jax.random.uniform(kw_, (Cout, Cin, KH, KW), jnp.float32, -bound, bound)
    bias = jax.random.uniform(kb, (Cout,), jnp.float32, -bound, bound)

    out = conv_leaky_relu2d(x, weight, bias, padding=1, negative_slope=negative_slope)
    out = jax.block_until_ready(out)

    # Reference: exact f32 conv (same semantics as nn.Conv2d NCHW/OIHW) + leaky relu.
    ref = lax.conv_general_dilated(
        x, weight, window_strides=(1, 1), padding=((1, 1), (1, 1)),
        dimension_numbers=("NCHW", "OIHW", "NCHW"),
        precision=lax.Precision.HIGHEST,
    ) + bias.reshape(1, Cout, 1, 1)
    ref = jnp.where(ref >= 0, ref, negative_slope * ref)

    # bf16 MXU operands (f32 accumulation) -> looser tolerance than a pure-f32 path.
    if not jnp.allclose(out, ref, atol=2e-2, rtol=2e-2):
        raise AssertionError("Pallas conv+leaky_relu mismatch vs reference")

    print("KERNEL_OK")
</pallas_src>

<mosaic_0001>
module attributes {stable_mosaic.version = 11 : i64} {
  func.func @_conv_lrelu_kernel(%arg0: i32, %arg1: memref<1x8x256xf32, #tpu.memory_space<vmem>>, %arg2: memref<8x72xf32, #tpu.memory_space<vmem>>, %arg3: memref<8x1xf32, #tpu.memory_space<vmem>>, %arg4: memref<1x256xi32, #tpu.memory_space<vmem>>, %arg5: memref<1x8x256xf32, #tpu.memory_space<vmem>>) attributes {dimension_semantics = [#tpu.dimension_semantics<parallel>], iteration_bounds = array<i64: 2>, scalar_prefetch = 0 : i64, scratch_operands = 0 : i64, tpu.core_type = #tpu.core_type<tc>, window_params = [{transform_indices = @transform_0, window_bounds = array<i64: 1, 8, 256>}, {pipeline_mode = #tpu.pipeline_mode<synchronous>, transform_indices = @transform_1, window_bounds = array<i64: 8, 72>}, {pipeline_mode = #tpu.pipeline_mode<synchronous>, transform_indices = @transform_2, window_bounds = array<i64: 8, 1>}, {pipeline_mode = #tpu.pipeline_mode<synchronous>, transform_indices = @transform_3, window_bounds = array<i64: 1, 256>}, {transform_indices = @transform_4, window_bounds = array<i64: 1, 8, 256>}]} {
    %c0 = arith.constant 0 : index
    %c0_0 = arith.constant 0 : index
    %c0_1 = arith.constant 0 : index
    %0 = vector.load %arg1[%c0, %c0_0, %c0_1] : memref<1x8x256xf32, #tpu.memory_space<vmem>>, vector<1x8x256xf32>
    %1 = vector.shape_cast %0 : vector<1x8x256xf32> to vector<8x256xf32>
    %c0_2 = arith.constant 0 : index
    %c0_3 = arith.constant 0 : index
    %2 = vector.load %arg4[%c0_2, %c0_3] : memref<1x256xi32, #tpu.memory_space<vmem>>, vector<1x256xi32>
    %cst = arith.constant 0.000000e+00 : f32
    %3 = vector.broadcast %cst : f32 to vector<8x128xf32>
    %4 = tpu.concatenate %3, %1, %3 in 1 : vector<8x128xf32>, vector<8x256xf32>, vector<8x128xf32> -> vector<8x512xf32>
    %5 = vector.extract_strided_slice %4 {offsets = [0, 111], sizes = [8, 256], strides = [1, 1]} : vector<8x512xf32> to vector<8x256xf32>
    %c1_i32 = arith.constant 1 : i32
    %6 = vector.broadcast %c1_i32 : i32 to vector<1x256xi32>
    %7 = arith.cmpi sge, %2, %6 : vector<1x256xi32>
    %cst_4 = arith.constant 0.000000e+00 : f32
    %8 = vector.shape_cast %7 : vector<1x256xi1> to vector<1x256xi1>
    %9 = vector.broadcast %8 : vector<1x256xi1> to vector<8x256xi1>
    %10 = vector.broadcast %cst_4 : f32 to vector<8x256xf32>
    %11 = arith.select %9, %5, %10 : vector<8x256xi1>, vector<8x256xf32>
    %12 = vector.extract_strided_slice %4 {offsets = [0, 112], sizes = [8, 256], strides = [1, 1]} : vector<8x512xf32> to vector<8x256xf32>
    %13 = vector.extract_strided_slice %4 {offsets = [0, 113], sizes = [8, 256], strides = [1, 1]} : vector<8x512xf32> to vector<8x256xf32>
    %c15_i32 = arith.constant 15 : i32
    %14 = vector.broadcast %c15_i32 : i32 to vector<1x256xi32>
    %15 = arith.cmpi slt, %2, %14 : vector<1x256xi32>
    %cst_5 = arith.constant 0.000000e+00 : f32
    %16 = vector.shape_cast %15 : vector<1x256xi1> to vector<1x256xi1>
    %17 = vector.broadcast %16 : vector<1x256xi1> to vector<8x256xi1>
    %18 = vector.broadcast %cst_5 : f32 to vector<8x256xf32>
    %19 = arith.select %17, %13, %18 : vector<8x256xi1>, vector<8x256xf32>
    %20 = vector.extract_strided_slice %4 {offsets = [0, 127], sizes = [8, 256], strides = [1, 1]} : vector<8x512xf32> to vector<8x256xf32>
    %c1_i32_6 = arith.constant 1 : i32
    %21 = vector.broadcast %c1_i32_6 : i32 to vector<1x256xi32>
    %22 = arith.cmpi sge, %2, %21 : vector<1x256xi32>
    %cst_7 = arith.constant 0.000000e+00 : f32
    %23 = vector.shape_cast %22 : vector<1x256xi1> to vector<1x256xi1>
    %24 = vector.broadcast %23 : vector<1x256xi1> to vector<8x256xi1>
    %25 = vector.broadcast %cst_7 : f32 to vector<8x256xf32>
    %26 = arith.select %24, %20, %25 : vector<8x256xi1>, vector<8x256xf32>
    %27 = vector.extract_strided_slice %4 {offsets = [0, 128], sizes = [8, 256], strides = [1, 1]} : vector<8x512xf32> to vector<8x256xf32>
    %28 = vector.extract_strided_slice %4 {offsets = [0, 129], sizes = [8, 256], strides = [1, 1]} : vector<8x512xf32> to vector<8x256xf32>
    %c15_i32_8 = arith.constant 15 : i32
    %29 = vector.broadcast %c15_i32_8 : i32 to vector<1x256xi32>
    %30 = arith.cmpi slt, %2, %29 : vector<1x256xi32>
    %cst_9 = arith.constant 0.000000e+00 : f32
    %31 = vector.shape_cast %30 : vector<1x256xi1> to vector<1x256xi1>
    %32 = vector.broadcast %31 : vector<1x256xi1> to vector<8x256xi1>
    %33 = vector.broadcast %cst_9 : f32 to vector<8x256xf32>
    %34 = arith.select %32, %28, %33 : vector<8x256xi1>, vector<8x256xf32>
    %35 = vector.extract_strided_slice %4 {offsets = [0, 143], sizes = [8, 256], strides = [1, 1]} : vector<8x512xf32> to vector<8x256xf32>
    %c1_i32_10 = arith.constant 1 : i32
    %36 = vector.broadcast %c1_i32_10 : i32 to vector<1x256xi32>
    %37 = arith.cmpi sge, %2, %36 : vector<1x256xi32>
    %cst_11 = arith.constant 0.000000e+00 : f32
    %38 = vector.shape_cast %37 : vector<1x256xi1> to vector<1x256xi1>
    %39 = vector.broadcast %38 : vector<1x256xi1> to vector<8x256xi1>
    %40 = vector.broadcast %cst_11 : f32 to vector<8x256xf32>
    %41 = arith.select %39, %35, %40 : vector<8x256xi1>, vector<8x256xf32>
    %42 = vector.extract_strided_slice %4 {offsets = [0, 144], sizes = [8, 256], strides = [1, 1]} : vector<8x512xf32> to vector<8x256xf32>
    %43 = vector.extract_strided_slice %4 {offsets = [0, 145], sizes = [8, 256], strides = [1, 1]} : vector<8x512xf32> to vector<8x256xf32>
    %c15_i32_12 = arith.constant 15 : i32
    %44 = vector.broadcast %c15_i32_12 : i32 to vector<1x256xi32>
    %45 = arith.cmpi slt, %2, %44 : vector<1x256xi32>
    %cst_13 = arith.constant 0.000000e+00 : f32
    %46 = vector.shape_cast %45 : vector<1x256xi1> to vector<1x256xi1>
    %47 = vector.broadcast %46 : vector<1x256xi1> to vector<8x256xi1>
    %48 = vector.broadcast %cst_13 : f32 to vector<8x256xf32>
    %49 = arith.select %47, %43, %48 : vector<8x256xi1>, vector<8x256xf32>
    %50 = tpu.concatenate %11, %12, %19, %26, %27, %34, %41, %42, %49 in 0 : vector<8x256xf32>, vector<8x256xf32>, vector<8x256xf32>, vector<8x256xf32>, vector<8x256xf32>, vector<8x256xf32>, vector<8x256xf32>, vector<8x256xf32>, vector<8x256xf32> -> vector<72x256xf32>
    %c0_14 = arith.constant 0 : index
    %c0_15 = arith.constant 0 : index
    %51 = vector.load %arg2[%c0_14, %c0_15] : memref<8x72xf32, #tpu.memory_space<vmem>>, vector<8x72xf32>
    %52 = arith.truncf %51 : vector<8x72xf32> to vector<8x72xbf16>
    %53 = arith.truncf %50 : vector<72x256xf32> to vector<72x256xbf16>
    %cst_16 = arith.constant dense<0.000000e+00> : vector<8x256xf32>
    %54 = tpu.matmul %52, %53, %cst_16 {dimension_numbers = #tpu.dot_dimension_numbers<[1], [0], [0], [1], [0, 0, 1, 1], [], []>} : vector<8x72xbf16>, vector<72x256xbf16>, vector<8x256xf32> -> vector<8x256xf32>
    %c0_17 = arith.constant 0 : index
    %c0_18 = arith.constant 0 : index
    %55 = vector.load %arg3[%c0_17, %c0_18] : memref<8x1xf32, #tpu.memory_space<vmem>>, vector<8x1xf32>
    %56 = vector.broadcast %55 : vector<8x1xf32> to vector<8x256xf32>
    %57 = arith.addf %54, %56 : vector<8x256xf32>
    %cst_19 = arith.constant 0.000000e+00 : f32
    %58 = vector.broadcast %cst_19 : f32 to vector<8x256xf32>
    %59 = arith.cmpf oge, %57, %58 : vector<8x256xf32>
    %cst_20 = arith.constant 2.000000e-01 : f32
    %60 = vector.broadcast %cst_20 : f32 to vector<8x256xf32>
    %61 = arith.mulf %60, %57 : vector<8x256xf32>
    %62 = arith.select %59, %57, %61 : vector<8x256xi1>, vector<8x256xf32>
    %63 = vector.shape_cast %62 : vector<8x256xf32> to vector<1x8x256xf32>
    %c0_21 = arith.constant 0 : index
    %c0_22 = arith.constant 0 : index
    %c0_23 = arith.constant 0 : index
    %64 = vector.load %arg5[%c0_21, %c0_22, %c0_23] : memref<1x8x256xf32, #tpu.memory_space<vmem>>, vector<1x8x256xf32>
    tpu.vector_store %arg5[%c0_21, %c0_22, %c0_23], %63 {strides = array<i32>} : memref<1x8x256xf32, #tpu.memory_space<vmem>>, vector<1x8x256xf32>,
    return
  }
  func.func @transform_0(%arg0: i32) -> (i32, i32, i32) {
    %c0_i32 = arith.constant 0 : i32
    %c0_i32_0 = arith.constant 0 : i32
    %c0_i32_1 = arith.constant 0 : i32
    return %arg0, %c0_i32, %c0_i32_0 : i32, i32, i32
  }
  func.func @transform_1(%arg0: i32) -> (i32, i32) {
    %c0_i32 = arith.constant 0 : i32
    %c0_i32_0 = arith.constant 0 : i32
    %c0_i32_1 = arith.constant 0 : i32
    return %c0_i32, %c0_i32_0 : i32, i32
  }
  func.func @transform_2(%arg0: i32) -> (i32, i32) {
    %c0_i32 = arith.constant 0 : i32
    %c0_i32_0 = arith.constant 0 : i32
    %c0_i32_1 = arith.constant 0 : i32
    return %c0_i32, %c0_i32_0 : i32, i32
  }
  func.func @transform_3(%arg0: i32) -> (i32, i32) {
    %c0_i32 = arith.constant 0 : i32
    %c0_i32_0 = arith.constant 0 : i32
    %c0_i32_1 = arith.constant 0 : i32
    return %c0_i32, %c0_i32_0 : i32, i32
  }
  func.func @transform_4(%arg0: i32) -> (i32, i32, i32) {
    %c0_i32 = arith.constant 0 : i32
    %c0_i32_0 = arith.constant 0 : i32
    %c0_i32_1 = arith.constant 0 : i32
    return %arg0, %c0_i32, %c0_i32_0 : i32, i32, i32
  }
}

</mosaic_0001>

<bundles_post_ra>
// kernel: tpu_custom_call.1
= control target key start
LH: loop header
LB: loop body
LE: loop exit
PB: predicated region body
PF: predicated region fallthrough
CT: control target
= control target key end

     0   :  { %9 = vsyncpa [#allocation3], 0  ;;  %s1018_s0 = inlined_call_operand.hbm [shape: f32[2,8,256], index: 0, kind: input, shape index: {}]   ;;  %s1019_s1 = inlined_call_operand.vmem [shape: f32[8,72], index: 1, kind: input, shape index: {}]   ;;  %s1020_s2 = inlined_call_operand.vmem [shape: f32[8,1], index: 2, kind: input, shape index: {}]   ;;  %s1021_s3 = inlined_call_operand.vmem [shape: s32[1,256], index: 3, kind: input, shape index: {}]   ;;  %s1022_s4 = inlined_call_operand.hbm [shape: f32[2,8,256], index: 4, kind: output, shape index: {}]  }
   0x1   :  { %11 = vsyncpa [#allocation3 + $0x1], 0 }
   0x2   :  { %12 = vsyncpa [#allocation4], 0 }
   0x3   :  { %14 = vsyncpa [#allocation4 + $0x1], 0  ;;  %s784_s15 = smov 0   ;;  %s786_s16 = smov 0  }
   0x4   :  { %s788_s17 = smov 0   ;;  %s790_s18 = smov 0  }
   0x5 LB: > { %s805_s19 = sadd.s32 4294967295, %s744_s18   ;;  %s508_s20 = sadd.s32 4294967294, %s744_s18   ;;  %s744_s18 = sphi %s790_s18, %s1041_s18   ;;  %s740_s17 = sphi %s788_s17, %s1040_s17   ;;  %s736_s16 = sphi %s786_s16, %s1039_s16   ;;  %s732_s15 = sphi %s784_s15, %s1038_s15  }
   0x6   : > { %s809_s21 = sadd.s32 1, %s744_s18   ;;  %s27_s22 = sadd.s32 1, %s740_s17 }
   0x7   : > { %s24_s23 = ssub.s32 %s744_s18, %s809_s21  ;;  %p34_p0 = scmp.ne.s32.totalorder %s740_s17, %s736_s16 }
   0x8   : > { %p25_p1 = scmp.eq.s32.totalorder %s24_s23, 0  ;;  %p35_p2 = scmp.eq.s32.totalorder %s744_s18, 0 }
   0x9   : > { %p40_p3 = scmp.ne.s32.totalorder %s736_s16, %s732_s15  ;;  %p41_p4 = scmp.eq.s32.totalorder %s805_s19, 0 }
   0xa   : > { %s821_s24 = scalar_select %p25_p1, %s740_s17, %s27_s22  }
   0xb   : > { %p823_p5 = por %p35_p2, %p34_p0  ;;  %p827_p6 = por %p41_p4, %p40_p3 }
   0xc   : > { %p127_p7 = scmp.eq.s32.totalorder %s805_s19, 1  ;;  %p133_p8 = scmp.eq.s32.totalorder %s508_s20, 1 }
   0xd   : > { %p562_p10 = scmp.lt.s32.totalorder %s744_s18, 2  ;;  %s162_s29 = sand.u32 1, %s740_s17  }
   0xe   : > { %p834_p11 = por %p127_p7, %p34_p0  ;;  %p838_p12 = por %p133_p8, %p40_p3 }
   0xf   : > { %s548_s30 = sshll.u32 %s744_s18, 8  ;;  %s511_s5 = sshll.u32 %s162_s29, 4 }
  0x10   : > { %s1026_s27 = scalar_select %p834_p11, 1, 0 }
  0x11   : > { %s1027_s28 = scalar_select %p838_p12, 1, 0 }
  0x12   : > { %s847_s8 = scalar_lea.hbm %s1018_s0, %s548_s30  ;;  %s166_s9 = scalar_lea.vmem [#allocation2], %s511_s5 }
  0x13   : > { %s174_s10 = sshll.u32 %s166_s9, 4  ;;  %p851_p13 = pnand %p562_p10, %p823_p5  ;;  %s855_s10 = int_to_ptr.vmem [resolvable:$true] %s174_s10 }
  0x14   : > { %s163_s12 = scalar_lea.sflag [#allocation3], %s162_s29  ;;  %s648_s13 = scalar_lea.hbm %s847_s8, 256 }
  0x15   : > { %p649_p2 = scmp.ne.s32.totalorder %s847_s8, %s648_s13  ;;  %p650_p3 = pneg %p851_p13 }
  0x16   : > { %s653_s22 = scalar_lea.hbm %s1018_s0, 512  ;;  %p654_p5 = scmp.lt.u32.totalorder %s847_s8, %s1018_s0 }
  0x17   : > { %p651_p4 = pnand %p650_p3, %p649_p2  ;;  %p655_p8 = scmp.lt.u32.totalorder %s653_s22, %s648_s13 }
  0x18   : > { %p657_p9 = scmp.lt.u32.totalorder %s648_s13, %s847_s8 }
  0x19   : > { %p652_p7 = pneg %p651_p4  ;;  %p656_p10 = por %p655_p8, %p654_p5 }
  0x1b   : > { %p658_p0 = por %p657_p9, %p656_p10 }
  0x1d   : > { %p659_p1 = pnand %p658_p0, %p652_p7 }
  0x1f   : > { %662 = shalt.err (!%p659_p1)
}
  0x20   : > { %s663_s29 = scalar_lea.vmem %s855_s10, 256  ;;  %s746_s30 = smov [#allocation2]  }
  0x21   : > { %p664_p2 = scmp.ne.s32.totalorder %s855_s10, %s663_s29  ;;  %s668_s5 = sshll.u32 %s746_s30, 4  ;;  %s669_s5 = int_to_ptr.vmem [resolvable:$false] %s668_s5 }
  0x22   : > { %s670_s6 = scalar_lea.vmem %s669_s5, 512  ;;  %p671_p11 = scmp.lt.s32.totalorder %s855_s10, %s669_s5 }
  0x23   : > { %p666_p4 = pnand %p664_p2, %p650_p3  ;;  %p672_p5 = scmp.lt.s32.totalorder %s670_s6, %s663_s29 }
  0x25   : > { %p667_p12 = pneg %p666_p4  ;;  %p673_p8 = por %p672_p5, %p671_p11 }
  0x27   : > { %p674_p9 = pnand %p673_p8, %p667_p12 }
  0x29   : > { %677 = shalt.err (!%p674_p9)
}
  0x2a   : > { %557 = dma.hbm_to_vmem [thread:$0]  (!%p851_p13), %s847_s8, 256, %s855_s10, %s163_s12  }
  0x2b   : > { %p1029_p0 = scmp.lt.s32.totalorder %s744_s18, 3  ;;  %p1030_p1 = scmp.ge.s32.totalorder %s744_s18, 1 }
  0x2d   : > { %p180_p3 = pnand %p1030_p1, %p1029_p0 }
  0x2e   : > { %s889_s7 = sand.u32 (!%p180_p3), 1, %s736_s16  }
  0x2f   : > { %183 = sbr.rel (%p180_p3) target bundleno = 444 (0x1bc), region = 36  ;;  %s515_s9 = sshll.u32 (!%p180_p3), %s889_s7, 4 }
  0x30   : > { %s186_s13 = scalar_lea.sflag (!%p180_p3), [#allocation3], %s889_s7  ;;  %s189_s11 = scalar_lea.vmem (!%p180_p3), [#allocation2], %s515_s9 }
  0x36   : > { %723 = dma.done.wait (%p827_p6), %s186_s13, 256  }
  0x37   : > { %725 = vsyncadd (%p827_p6), %s186_s13, 4294967040  ;;  %v747_v0 = vmov 0.0   ;;  %s748_s8 = smov 17   ;;  %v749_v1 = vmov 0   ;;  %s750_s10 = smov 16   ;;  %v899_v2 = vld [vmem:[%s189_s11] sm:$0xff]  ;;  %v220_v7 = vlaneseq }
  0x38   : > { %233 = vrot.lane.b32.xlu1 %v747_v0, %s748_s8  ;;  %406 = vmatprep.mubr.bf16.mxu0 %v749_v1  ;;  %v901_v3 = vld [vmem:[%s189_s11 + $0x8] sm:$0xff]  ;;  %s751_s12 = smov 1   ;;  %s752_s26 = smov 15   ;;  %v357_v6 = vld [vmem:[%s1020_s2] sm:$0xff]  ;;  %vm239_vm2 = vcmask 138240   ;;  %vm329_vm3 = vcmask 130048  }
  0x39   : > { %647 = vset.pattern.permute.xlu0 %v749_v1  ;;  %v607_v4 = vpack.i.bf16 %v901_v3, %v899_v2  ;;  %s753_s14 = smov 127   ;;  %v637_v5 = vpack.i.bf16 %v747_v0, %v901_v3  ;;  %s754_s20 = smov 112   ;;  %v217_v9 = vld [vmem:[%s1021_s3] sm:$0x3]  ;;  %v221_v10 = vshrl.u32 %v220_v7, 7  ;;  %vm277_vm6 = vcmask 7168  }
  0x3a   : > { %s755_s22 = smov 113   ;;  %s756_s23 = smov 111   ;;  %vm218_vm0 = vcmp.ge.s32.totalorder %v217_v9, 1  ;;  %vm246_vm1 = vcmp.lt.s32.totalorder %v217_v9, 15  ;;  %vm757_vm7 = vmmov 1   ;;  %vm264_vm11 = vcmask 121856  }
  0x3b   : > { %608 = vrot.lane.b32.xlu0 %v607_v4, %s748_s8  ;;  %v226_v12 = vsub.s32 1, %v221_v10  ;;  %v222_v13 = vsub.s32 0, %v221_v10  ;;  %v219_v14 = vsel %vm218_vm0, 1, %v749_v1  ;;  %v247_v19 = vsel %vm246_vm1, 1, %v749_v1  ;;  %s549_s11 = sshll.u32 %s805_s19, 8  ;;  %s213_s8 = scalar_lea.vmem [#allocation5], %s515_s9 }
  0x3c   : > { %323 = vrot.lane.b32.xlu1 %v747_v0, %s750_s10  ;;  %vm290_vm15 = vcmask 1039360   ;;  %vm340_vm0 = vcmask 916480   ;;  %s424_s19 = scalar_lea.sflag [#allocation4], %s889_s7  ;;  %p1035_p11 = scmp.ne.s32.totalorder %s1026_s27, 0 }
  0x3d   : > { %v227_v17 = vrot.slane %v219_v14, %v226_v12  ;;  %v223_v18 = vrot.slane %v219_v14, %v222_v13  ;;  %v915_v23 = vrot.slane %v247_v19, %v226_v12  ;;  %v917_v29 = vrot.slane %v247_v19, %v222_v13  ;;  %v345_v14 = vld [vmem:[%s1019_s1] sm:$0xff] }
  0x3f   : > { %613 = vrot.lane.b32.xlu0 %v607_v4, %s750_s10  ;;  %vm229_vm4 = vcmp.eq.s32.totalorder %v227_v17, 1  ;;  %vm228_vm5 = vcmp.eq.s32.totalorder %v223_v18, 1  ;;  %vm257_vm9 = vcmp.eq.s32.totalorder %v915_v23, 1  ;;  %vm256_vm12 = vcmp.eq.s32.totalorder %v917_v29, 1  ;;  %s438_s10 = sshll.u32 %s213_s8, 4  ;;  %s976_s10 = int_to_ptr.vmem [resolvable:$true] %s438_s10 }
  0x40   : > { %623 = vrot.lane.b32.xlu1 %v607_v4, %s751_s12  ;;  %vm923_vm8 = vmpackc.low %vm757_vm7, %vm229_vm4  ;;  %v346_v18 = vpack.c.bf16 %v345_v14, %v345_v14  ;;  %s678_s9 = scalar_lea.vmem %s976_s10, 256 }
  0x41   : > { %vm932_vm10 = vmpackc.low %vm757_vm7, %vm228_vm5  ;;  %p679_p6 = scmp.ne.s32.totalorder %s976_s10, %s678_s9 }
  0x42   : > { %vm523_vm13 = vmpackc.low %vm229_vm4, %vm257_vm9  ;;  %vm316_vm4 = vcmask 908288  }
  0x43   : > { %618 = vrot.lane.b32.xlu0 %v607_v4, %s752_s26  ;;  %vm526_vm14 = vmpackc.low %vm228_vm5, %vm256_vm12  ;;  %vm367_vm5 = vcmask 1043456   ;;  %p680_p12 = pnand %p679_p6, %p1035_p11 }
  0x44   : > { %271 = vrot.lane.b32.xlu1 %v747_v0, %s751_s12  ;;  %vm529_vm1 = vmpackc.low %vm257_vm9, %vm757_vm7 }
  0x45   : > { %p681_p13 = pneg %p680_p12 }
  0x47   : > { %258 = vrot.lane.b32.xlu0 %v747_v0, %s752_s26 }
  0x48   : > { %284 = vrot.lane.b32.xlu1 %v899_v2, %s753_s14 }
  0x4b   : > { %628 = vrot.lane.b32.xlu0 %v637_v5, %s753_s14  ;;  %s974_s14 = scalar_lea.hbm %s1022_s4, %s549_s11 }
  0x4c   : > { %638 = vrot.lane.b32.xlu1 %v637_v5, %s754_s20 }
  0x4f   : > { %633 = vrot.lane.b32.xlu0 %v637_v5, %s755_s22 }
  0x50   : > { %334 = vrot.lane.b32.xlu1 %v899_v2, %s754_s20  ;;  %s758_s20 = smov [#allocation5]  }
  0x53   : > { %297 = vrot.lane.b32.xlu0 %v899_v2, %s755_s22  ;;  %s682_s22 = sshll.u32 %s758_s20, 4  ;;  %s683_s22 = int_to_ptr.vmem [resolvable:$false] %s682_s22 }
  0x54   : > { %314 = vrot.lane.b32.xlu1 %v747_v0, %s756_s23  ;;  %p685_p7 = scmp.lt.s32.totalorder %s976_s10, %s683_s22 }
  0x57   : > { %643 = vrot.lane.b32.xlu0 %v607_v4, %s756_s23  ;;  %s684_s23 = scalar_lea.vmem %s683_s22, 512 }
  0x58   : > { %p686_p10 = scmp.lt.s32.totalorder %s684_s23, %s678_s9 }
  0x5a   : > { %p687_p2 = por %p686_p10, %p685_p7 }
  0x5b   : > { %360 = vperm.xlu0 %647, %v357_v6  }
  0x5c   : > { %p688_p4 = pnand %p687_p2, %p681_p13 }
  0xaa   : > { %v234_v8 = vpop.permute.xlu1 %233 }
  0xad   : > { %v609_v15 = vpop.permute.xlu0 %608 }
  0xae   : > { %v324_v11 = vpop.permute.xlu1 %323  ;;  %v611_v20 = vunpack.i.h.bf16 %v609_v15  ;;  %v610_v21 = vunpack.i.l.bf16 %v609_v15 }
  0xb0   : > { %v241_v30 = vsel %vm239_vm2, %v610_v21, %v611_v20  ;;  %v240_v33 = vsel %vm239_vm2, %v234_v8, %v610_v21  ;;  %vm532_vm2 = vmpackc.low %vm256_vm12, %vm757_vm7 }
  0xb1   : > { %v614_v22 = vpop.permute.xlu0 %613 }
  0xb2   : > { %v624_v16 = vpop.permute.xlu1 %623  ;;  %v616_v25 = vunpack.i.h.bf16 %v614_v22  ;;  %v615_v26 = vunpack.i.l.bf16 %v614_v22 }
  0xb3   : > { %v626_v27 = vunpack.i.h.bf16 %v624_v16  ;;  %v625_v28 = vunpack.i.l.bf16 %v624_v16 }
  0xb4   : > { %v331_v31 = vsel %vm329_vm3, %v615_v26, %v616_v25  ;;  %v330_v34 = vsel %vm329_vm3, %v324_v11, %v615_v26  ;;  %vm303_vm3 = vcmask 924672  }
  0xb5   : > { %v619_v35 = vpop.permute.xlu0 %618  ;;  %v518_v36 = vpack.c.bf16 %v331_v31, %v241_v30  ;;  %v521_v38 = vpack.c.bf16 %v330_v34, %v240_v33  ;;  %v279_v42 = vsel %vm277_vm6, %v625_v28, %v626_v27 }
  0xb6   : > { %v272_v24 = vpop.permute.xlu1 %271  ;;  %v621_v40 = vunpack.i.h.bf16 %v619_v35  ;;  %v620_v41 = vunpack.i.l.bf16 %v619_v35 }
  0xb7   : > { %519 = vmatprep.subr.msk.bf16.mxu0 %vm923_vm8, %v518_v36  ;;  %v278_v43 = vsel %vm277_vm6, %v272_v24, %v625_v28  ;;  %vm363_vm6 = vcmask 588800  }
  0xb8   : > { %522 = vmatpush1.bf16.msk.msra.mxu0 %vm932_vm10, %v521_v38  ;;  %v266_v44 = vsel %vm264_vm11, %v620_v41, %v621_v40 }
  0xb9   : > { %v259_v45 = vpop.permute.xlu0 %258  ;;  %v524_v46 = vpack.c.bf16 %v279_v42, %v266_v44 }
  0xba   : > { %v285_v39 = vpop.permute.xlu1 %284  ;;  %v265_v47 = vsel %vm264_vm11, %v259_v45, %v620_v41 }
  0xbb   : > { %v527_v48 = vpack.c.bf16 %v278_v43, %v265_v47  ;;  %525 = vmatprep.subr.msk.bf16.mxu0 %vm523_vm13, %v524_v46 }
  0xbd   : > { %v629_v50 = vpop.permute.xlu0 %628  ;;  %528 = vmatpush1.bf16.msk.msra.mxu0 %vm526_vm14, %v527_v48 }
  0xbe   : > { %v639_v49 = vpop.permute.xlu1 %638  ;;  %v631_v51 = vunpack.i.h.bf16 %v629_v50  ;;  %v630_v52 = vunpack.i.l.bf16 %v629_v50 }
  0xbf   : > { %v641_v53 = vunpack.i.h.bf16 %v639_v49  ;;  %v640_v54 = vunpack.i.l.bf16 %v639_v49 }
  0xc0   : > { %v291_v55 = vsel %vm290_vm15, %v285_v39, %v630_v52  ;;  %v292_v56 = vsel %vm290_vm15, %v630_v52, %v631_v51 }
  0xc1   : > { %v530_v57 = vpack.c.bf16 %v292_v56, %v901_v3  ;;  %v533_v58 = vpack.c.bf16 %v291_v55, %v899_v2  ;;  %v634_v59 = vpop.permute.xlu0 %633  ;;  %v342_v63 = vsel %vm340_vm0, %v640_v54, %v641_v53 }
  0xc2   : > { %v335_v60 = vpop.permute.xlu1 %334  ;;  %v636_v61 = vunpack.i.h.bf16 %v634_v59  ;;  %v635_v62 = vunpack.i.l.bf16 %v634_v59 }
  0xc3   : > { %531 = vmatprep.subr.msk.bf16.mxu0 %vm529_vm1, %v530_v57  ;;  %v341_v0 = vsel %vm340_vm0, %v335_v60, %v640_v54 }
  0xc4   : > { %534 = vmatpush1.bf16.msk.msra.mxu0 %vm532_vm2, %v533_v58  ;;  %v305_v1 = vsel %vm303_vm3, %v635_v62, %v636_v61 }
  0xc5   : > { %v298_v4 = vpop.permute.xlu0 %297  ;;  %v536_v5 = vpack.c.bf16 %v342_v63, %v305_v1 }
  0xc6   : > { %v304_v6 = vsel %vm303_vm3, %v298_v4, %v635_v62  ;;  %v315_v7 = vpop.permute.xlu1 %314 }
  0xc7   : > { %v539_v3 = vpack.c.bf16 %v341_v0, %v304_v6  ;;  %537 = vmatprep.subr.msk.bf16.mxu0 %vm923_vm8, %v536_v5 }
  0xc9   : > { %v644_v2 = vpop.permute.xlu0 %643  ;;  %540 = vmatpush1.bf16.msk.msra.mxu0 %vm932_vm10, %v539_v3 }
  0xca   : > { %v646_v8 = vunpack.i.h.bf16 %v644_v2  ;;  %v645_v9 = vunpack.i.l.bf16 %v644_v2 }
  0xcc   : > { %v318_v10 = vsel %vm316_vm4, %v646_v8, %v315_v7  ;;  %v317_v11 = vsel %vm316_vm4, %v645_v9, %v646_v8 }
  0xcd   : > { %v322_v12 = vsel %vm257_vm9, %v318_v10, 0.0  ;;  %v321_v13 = vsel %vm256_vm12, %v317_v11, 0.0 }
  0xce   : > { %v356_v15 = vpack.c.bf16 %v322_v12, %v322_v12  ;;  %v355_v16 = vpack.c.bf16 %v321_v13, %v321_v13 }
  0xd0   : > { %541 = vmatprep.subr.msk.bf16.mxu0 %vm367_vm5, %v356_v15  ;;  %v369_v17 = vsel %vm367_vm5, %v355_v16, 0 }
  0xd1   : > { %383 = vmatpush1.bf16.msra.mxu0 %v369_v17 }
  0xd4   : > { %542 = vmatmul.mubr.msk.bf16.vlgmr.msra.gmra.mrb[0].mxu0 %vm363_vm6, %v346_v18 }
  0xda   : > { %v361_v19 = vpop.permute.xlu0 %360 }
 0x1a7   : > { %v408_v20 = vpop.f32.mrb[0].mxu0 }
 0x1a8   : > { %v409_v21 = vadd.f32 %v408_v20, %v361_v19  ;;  %v410_v22 = vpop.f32.mrb[1].mxu0 }
 0x1a9   : > { %v411_v23 = vadd.f32 %v410_v22, %v361_v19  ;;  %v412_v24 = vpop.f32.mrb[2].mxu0 }
 0x1aa   : > { %vm415_vm7 = vcmp.ge.f32.partialorder %v409_v21, 0.0  ;;  %v417_v25 = vmul.f32 0.2, %v409_v21  ;;  %v413_v26 = vpop.f32.mrb[3].mxu0 }
 0x1ab   : > { %vm416_vm8 = vcmp.ge.f32.partialorder %v411_v23, 0.0  ;;  %v418_v27 = vmul.f32 0.2, %v411_v23 }
 0x1ac   : > { %v419_v28 = vsel %vm415_vm7, %v409_v21, %v417_v25 }
 0x1ad   : > { %421 = vst [vmem:[%s213_s8] sm:$0xff] %v419_v28  ;;  %v420_v29 = vsel %vm416_vm8, %v411_v23, %v418_v27 }
 0x1ae   : > { %422 = vst [vmem:[%s213_s8 + $0x8] sm:$0xff] %v420_v29 }
 0x1af   : > { %691 = shalt.err (!%p688_p4)
}
 0x1b0   : > { %s692_s7 = scalar_lea.hbm %s974_s14, 256  ;;  %s696_s30 = scalar_lea.hbm %s1022_s4, 512 }
 0x1b1   : > { %p693_p5 = scmp.ne.s32.totalorder %s974_s14, %s692_s7  ;;  %p697_p0 = scmp.lt.u32.totalorder %s974_s14, %s1022_s4 }
 0x1b2   : > { %p698_p1 = scmp.lt.u32.totalorder %s696_s30, %s692_s7  ;;  %p700_p6 = scmp.lt.u32.totalorder %s692_s7, %s974_s14 }
 0x1b3   : > { %p694_p8 = pnand %p693_p5, %p1035_p11 }
 0x1b4   : > { %p699_p3 = por %p698_p1, %p697_p0 }
 0x1b5   : > { %p695_p9 = pneg %p694_p8 }
 0x1b6   : > { %p701_p12 = por %p700_p6, %p699_p3 }
 0x1b8   : > { %p702_p13 = pnand %p701_p12, %p695_p9 }
 0x1ba   : > { %705 = shalt.err (!%p702_p13)
}
 0x1bb   : > { %552 = dma.vmem_to_hbm [thread:$0]  (%p1035_p11), %s976_s10, 256, %s974_s14, %s424_s19  }
 0x1bc PF: > { %s450_s13 = sand.u32 1, %s732_s15   ;;  %p1036_p7 = scmp.ne.s32.totalorder %s1027_s28, 0 }
 0x1bd   : > { %p1037_p10 = scmp.ge.s32.totalorder %s744_s18, 2  ;;  %s451_s11 = scalar_lea.sflag [#allocation4], %s450_s13 }
 0x1bf   : > { %p559_p2 = pnand %p1037_p10, %p1036_p7 }
 0x1c1   : > { %727 = dma.done.wait (!%p559_p2), %s451_s11, 256  }
 0x1c2   : > { %729 = vsyncadd (!%p559_p2), %s451_s11, 4294967040  ;;  %p17_p4 = scmp.ge.s32.totalorder %s809_s21, 4   ;;  %s1038_s15 = smov %s736_s16 }
 0x1c3   : > { %s1039_s16 = smov %s740_s17  ;;  %s1040_s17 = smov %s821_s24 }
 0x1c4   : > { %s1041_s18 = smov %s809_s21  ;;  %19 = sbr.rel (!%p17_p4) target bundleno = 5 (0x5), region = 81 }
 0x1cb   :  { %456 = vsyncpa [#allocation3], 1 }
 0x1cc   :  { %458 = vsyncpa [#allocation3 + $0x1], 1 }
 0x1cd   :  { %459 = vsyncpa [#allocation4], 1 }
 0x1ce   :  { %461 = vsyncpa [#allocation4 + $0x1], 1 }

</bundles_post_ra>
